<compile_context>
chip_gen: v5e
topology: v5e:2x2
jax: 0.10.0
libtpu: 0.0.40
codegen_flags: <defaults>
</compile_context>

<pallas_src>
import functools

import jax
import jax.numpy as jnp
from jax.experimental import pallas as pl
from jax.experimental.pallas import tpu as pltpu


def _round_up(v, m):
    return ((v + m - 1) // m) * m


def _fused_conv_kernel(x_ref, w_ref, b_ref, o_ref, acc_ref, *, m_rows, wst):
    """One (image n, Cout tile, Cin tile) step of the stride-2 3x3 conv.

    x_ref:   (Hs*Wst, 4*tc)  space-to-depth input slab for this channel block
    w_ref:   (4, 4*tc, TCo)  one (4*tc, TCo) weight matrix per 2x2 shift
    b_ref:   (1, TCo)        bias (float32)
    o_ref:   (m_rows, TCo)   output block (lane-dense, TCo multiple of 128)
    acc_ref: (m_rows, TCo)   float32 accumulator, lives across the kc axis
    """
    kc = pl.program_id(2)

    @pl.when(kc == 0)
    def _init():
        acc_ref[...] = jnp.zeros_like(acc_ref)

    # The four (row, col) shifts of the 2x2 space-to-depth grid; together with
    # the 4 spatial phases packed into the channel dim they cover all 9 taps.
    offsets = (0, 1, wst, wst + 1)  # shift (di, dj) -> di*wst + dj
    contrib = jnp.dot(x_ref[pl.ds(offsets[0], m_rows), :], w_ref[0],
                      preferred_element_type=jnp.float32)
    for s in range(1, 4):
        contrib = contrib + jnp.dot(x_ref[pl.ds(offsets[s], m_rows), :],
                                    w_ref[s],
                                    preferred_element_type=jnp.float32)
    acc_ref[...] += contrib

    @pl.when(kc == pl.num_programs(2) - 1)
    def _finalize():
        o_ref[...] = (acc_ref[...] + b_ref[...]).astype(o_ref.dtype)


def downsample(x_nchw, weight, bias, *, compute_dtype=None):
    """Downsample.forward (dims=2): Conv2d(C, Cout, 3, stride=2, padding=1)."""
    N, C, H, W = x_nchw.shape
    Cout, Cw, KH, KW = weight.shape
    assert Cw == C and KH == 3 and KW == 3
    Ho, Wo = (H + 1) // 2, (W + 1) // 2

    out_dtype = x_nchw.dtype
    if compute_dtype is None:
        # Pass jnp.bfloat16 here on v6e/v7x for 2x MXU / HBM throughput.
        compute_dtype = x_nchw.dtype

    # ---- tiling ---------------------------------------------------------
    tc = C if C <= 128 else 128              # Cin block -> per-step K = 4*tc
    KC = pl.cdiv(C, tc)
    Cp = KC * tc
    Coutp = _round_up(Cout, 128)             # lane-dense output
    TCo = 256 if Coutp % 256 == 0 else 128   # v6e/v7x MXU is 256 wide
    CO = Coutp // TCo

    Wst = _round_up(Wo + 1, 8)               # packed-W extent (incl. +1 halo col)
    Hs = Ho + 2                              # packed-H extent (incl. +1 halo row)
    m_rows = Ho * Wst                        # matmul M rows per grid step

    # ---- input repack: NCHW -> padded NHWC -> 2x2 space-to-depth --------
    x = jnp.transpose(x_nchw, (0, 2, 3, 1)).astype(compute_dtype)   # (N,H,W,C)
    xp = jnp.pad(x, ((0, 0),
                     (1, 2 * Hs - 1 - H),
                     (1, 2 * Wst - 1 - W),
                     (0, Cp - C)))
    # S[n, i*Wst + j, c*4 + a*2 + b] = xp[n, 2i + a, 2j + b, c]
    s_in = xp.reshape(N, Hs, 2, Wst, 2, Cp)
    s_in = jnp.transpose(s_in, (0, 1, 3, 5, 2, 4))   # [n, i, j, c, a, b]
    s_in = s_in.reshape(N, Hs * Wst, Cp * 4)

    # ---- weights: OIHW -> 4 shift matrices of shape (4*Cp, Coutp) --------
    # Wsd[di*2+dj, c*4 + a*2 + b, co] = weight[co, c, 2*di + a, 2*dj + b]
    # (zero where 2*di+a == 3 or 2*dj+b == 3, i.e. outside the 3x3 kernel).
    wz = jnp.zeros((Cout, Cp, 4, 4), weight.dtype)
    wz = wz.at[:, :C, :3, :3].set(weight)
    wz = wz.reshape(Cout, Cp, 2, 2, 2, 2)                     # [co,c,di,a,dj,b]
    w_sd = jnp.transpose(wz, (2, 4, 1, 3, 5, 0))              # [di,dj,c,a,b,co]
    w_sd = w_sd.reshape(4, Cp * 4, Cout)
    w_sd = jnp.pad(w_sd, ((0, 0), (0, 0), (0, Coutp - Cout))).astype(compute_dtype)

    b2 = jnp.pad(bias.astype(jnp.float32), (0, Coutp - Cout)).reshape(1, Coutp)

    # ---- VMEM budget / cost hints ---------------------------------------
    itemsize = jnp.dtype(compute_dtype).itemsize
    x_blk = Hs * Wst * 4 * tc * itemsize
    w_blk = 4 * 4 * tc * TCo * itemsize
    o_blk = m_rows * TCo * jnp.dtype(out_dtype).itemsize
    acc_blk = m_rows * TCo * 4
    est = 2 * (x_blk + w_blk + o_blk) + acc_blk + 2 * Coutp * 4
    # Keep within the most conservative default scoped VMEM across v5e/v6e/v7x.
    vmem_limit = int(min(max(2 * est, 16 * 1024 * 1024), 32 * 1024 * 1024))

    cost = pl.CostEstimate(
        flops=int(2 * 4 * N * m_rows * (4 * Cp) * Coutp),
        transcendentals=0,
        bytes_accessed=int(s_in.size * itemsize
                           + N * w_sd.size * itemsize
                           + N * m_rows * Coutp * jnp.dtype(out_dtype).itemsize),
    )

    kernel = functools.partial(_fused_conv_kernel, m_rows=m_rows, wst=Wst)

    out_flat = pl.pallas_call(
        kernel,
        out_shape=jax.ShapeDtypeStruct((N, m_rows, Coutp), out_dtype),
        grid_spec=pltpu.PrefetchScalarGridSpec(
            num_scalar_prefetch=0,
            grid=(N, CO, KC),                # kc (reduction) innermost
            in_specs=[
                pl.BlockSpec((None, Hs * Wst, 4 * tc),
                             lambda n, co, kc: (n, 0, kc)),
                pl.BlockSpec((4, 4 * tc, TCo),
                             lambda n, co, kc: (0, kc, co)),
                pl.BlockSpec((1, TCo),
                             lambda n, co, kc: (0, co)),
            ],
            out_specs=pl.BlockSpec((None, m_rows, TCo),
                                   lambda n, co, kc: (n, 0, co)),
            scratch_shapes=[pltpu.VMEM((m_rows, TCo), jnp.float32)],
        ),
        compiler_params=pltpu.CompilerParams(
            dimension_semantics=("parallel", "parallel", "arbitrary"),
            vmem_limit_bytes=vmem_limit,
        ),
        cost_estimate=cost,
    )(s_in, w_sd, b2)

    # Unpack: drop dead columns / padded channels, back to NCHW.
    out = out_flat.reshape(N, Ho, Wst, Coutp)[:, :, :Wo, :Cout]
    return jnp.transpose(out, (0, 3, 1, 2))


if __name__ == "__main__":
    # Module config: channels=4, dims=2, out_channels defaults to channels.
    channels = 4
    out_channels = 4
    N, H, W = 2, 16, 16

    key = jax.random.PRNGKey(0)
    kx, kw, kb = jax.random.split(key, 3)

    x = jax.random.normal(kx, (N, channels, H, W), dtype=jnp.float32)
    # Deterministic synthetic Conv2d parameters (shapes per nn.Conv2d(C, Cout, 3)).
    weight = jax.random.normal(kw, (out_channels, channels, 3, 3),
                               dtype=jnp.float32) * 0.1
    bias = jax.random.normal(kb, (out_channels,), dtype=jnp.float32) * 0.1

    y = downsample(x, weight, bias)
    y = jax.block_until_ready(y)

    # Cross-check against XLA's conv (same semantics as torch Conv2d NCHW).
    ref = jax.lax.conv_general_dilated(
        x, weight, window_strides=(2, 2), padding=((1, 1), (1, 1)),
        dimension_numbers=("NCHW", "OIHW", "NCHW"),
    ) + bias.reshape(1, -1, 1, 1)

    assert y.shape == (N, out_channels, (H + 1) // 2, (W + 1) // 2)
    assert jnp.allclose(y, ref, atol=2e-3, rtol=2e-3), \
        float(jnp.max(jnp.abs(y - ref)))

    print("KERNEL_OK")
</pallas_src>

<mosaic_0001>
module attributes {stable_mosaic.version = 11 : i64} {
  func.func @_fused_conv_kernel(%arg0: i32, %arg1: i32, %arg2: i32, %arg3: memref<1x160x16xf32, #tpu.memory_space<vmem>>, %arg4: memref<4x16x128xf32, #tpu.memory_space<vmem>>, %arg5: memref<1x128xf32, #tpu.memory_space<vmem>>, %arg6: memref<1x128x128xf32, #tpu.memory_space<vmem>>, %arg7: memref<128x128xf32, #tpu.memory_space<vmem>>) attributes {dimension_semantics = [#tpu.dimension_semantics<parallel>, #tpu.dimension_semantics<parallel>, #tpu.dimension_semantics<arbitrary>], iteration_bounds = array<i64: 2, 1, 1>, scalar_prefetch = 0 : i64, scratch_operands = 1 : i64, tpu.core_type = #tpu.core_type<tc>, window_params = [{transform_indices = @transform_0, window_bounds = array<i64: 1, 160, 16>}, {transform_indices = @transform_1, window_bounds = array<i64: 4, 16, 128>}, {transform_indices = @transform_2, window_bounds = array<i64: 1, 128>}, {transform_indices = @transform_3, window_bounds = array<i64: 1, 128, 128>}]} {
    %c0_i32 = arith.constant 0 : i32
    %0 = arith.cmpi eq, %arg2, %c0_i32 : i32
    %1 = arith.extui %0 : i1 to i32
    %c0_i32_0 = arith.constant 0 : i32
    %2 = arith.cmpi ne, %1, %c0_i32_0 : i32
    scf.if %2 {
      %cst_28 = arith.constant 0.000000e+00 : f32
      %32 = vector.broadcast %cst_28 : f32 to vector<128x128xf32>
      %c0_29 = arith.constant 0 : index
      %c0_30 = arith.constant 0 : index
      %33 = vector.load %arg7[%c0_29, %c0_30] : memref<128x128xf32, #tpu.memory_space<vmem>>, vector<128x128xf32>
      tpu.vector_store %arg7[%c0_29, %c0_30], %32 {strides = array<i32>} : memref<128x128xf32, #tpu.memory_space<vmem>>, vector<128x128xf32>,
    } else {
    }
    %c0 = arith.constant 0 : index
    %c0_1 = arith.constant 0 : index
    %c0_2 = arith.constant 0 : index
    %3 = vector.load %arg3[%c0, %c0_1, %c0_2] : memref<1x160x16xf32, #tpu.memory_space<vmem>>, vector<1x128x16xf32>
    %4 = vector.shape_cast %3 : vector<1x128x16xf32> to vector<128x16xf32>
    %c0_3 = arith.constant 0 : index
    %c0_4 = arith.constant 0 : index
    %c0_5 = arith.constant 0 : index
    %5 = vector.load %arg4[%c0_3, %c0_4, %c0_5] : memref<4x16x128xf32, #tpu.memory_space<vmem>>, vector<1x16x128xf32>
    %6 = vector.shape_cast %5 : vector<1x16x128xf32> to vector<16x128xf32>
    %cst = arith.constant dense<0.000000e+00> : vector<128x128xf32>
    %7 = tpu.matmul %4, %6, %cst {dimension_numbers = #tpu.dot_dimension_numbers<[1], [0], [0], [1], [0, 0, 1, 1], [], []>} : vector<128x16xf32>, vector<16x128xf32>, vector<128x128xf32> -> vector<128x128xf32>
    %c0_6 = arith.constant 0 : index
    %c1 = arith.constant 1 : index
    %c0_7 = arith.constant 0 : index
    %8 = vector.load %arg3[%c0_6, %c1, %c0_7] : memref<1x160x16xf32, #tpu.memory_space<vmem>>, vector<1x128x16xf32>
    %9 = vector.shape_cast %8 : vector<1x128x16xf32> to vector<128x16xf32>
    %c1_8 = arith.constant 1 : index
    %c0_9 = arith.constant 0 : index
    %c0_10 = arith.constant 0 : index
    %10 = vector.load %arg4[%c1_8, %c0_9, %c0_10] : memref<4x16x128xf32, #tpu.memory_space<vmem>>, vector<1x16x128xf32>
    %11 = vector.shape_cast %10 : vector<1x16x128xf32> to vector<16x128xf32>
    %cst_11 = arith.constant dense<0.000000e+00> : vector<128x128xf32>
    %12 = tpu.matmul %9, %11, %cst_11 {dimension_numbers = #tpu.dot_dimension_numbers<[1], [0], [0], [1], [0, 0, 1, 1], [], []>} : vector<128x16xf32>, vector<16x128xf32>, vector<128x128xf32> -> vector<128x128xf32>
    %13 = arith.addf %7, %12 : vector<128x128xf32>
    %c0_12 = arith.constant 0 : index
    %c16 = arith.constant 16 : index
    %c0_13 = arith.constant 0 : index
    %14 = vector.load %arg3[%c0_12, %c16, %c0_13] : memref<1x160x16xf32, #tpu.memory_space<vmem>>, vector<1x128x16xf32>
    %15 = vector.shape_cast %14 : vector<1x128x16xf32> to vector<128x16xf32>
    %c2 = arith.constant 2 : index
    %c0_14 = arith.constant 0 : index
    %c0_15 = arith.constant 0 : index
    %16 = vector.load %arg4[%c2, %c0_14, %c0_15] : memref<4x16x128xf32, #tpu.memory_space<vmem>>, vector<1x16x128xf32>
    %17 = vector.shape_cast %16 : vector<1x16x128xf32> to vector<16x128xf32>
    %cst_16 = arith.constant dense<0.000000e+00> : vector<128x128xf32>
    %18 = tpu.matmul %15, %17, %cst_16 {dimension_numbers = #tpu.dot_dimension_numbers<[1], [0], [0], [1], [0, 0, 1, 1], [], []>} : vector<128x16xf32>, vector<16x128xf32>, vector<128x128xf32> -> vector<128x128xf32>
    %19 = arith.addf %13, %18 : vector<128x128xf32>
    %c0_17 = arith.constant 0 : index
    %c17 = arith.constant 17 : index
    %c0_18 = arith.constant 0 : index
    %20 = vector.load %arg3[%c0_17, %c17, %c0_18] : memref<1x160x16xf32, #tpu.memory_space<vmem>>, vector<1x128x16xf32>
    %21 = vector.shape_cast %20 : vector<1x128x16xf32> to vector<128x16xf32>
    %c3 = arith.constant 3 : index
    %c0_19 = arith.constant 0 : index
    %c0_20 = arith.constant 0 : index
    %22 = vector.load %arg4[%c3, %c0_19, %c0_20] : memref<4x16x128xf32, #tpu.memory_space<vmem>>, vector<1x16x128xf32>
    %23 = vector.shape_cast %22 : vector<1x16x128xf32> to vector<16x128xf32>
    %cst_21 = arith.constant dense<0.000000e+00> : vector<128x128xf32>
    %24 = tpu.matmul %21, %23, %cst_21 {dimension_numbers = #tpu.dot_dimension_numbers<[1], [0], [0], [1], [0, 0, 1, 1], [], []>} : vector<128x16xf32>, vector<16x128xf32>, vector<128x128xf32> -> vector<128x128xf32>
    %25 = arith.addf %19, %24 : vector<128x128xf32>
    %c0_22 = arith.constant 0 : index
    %c0_23 = arith.constant 0 : index
    %26 = vector.load %arg7[%c0_22, %c0_23] : memref<128x128xf32, #tpu.memory_space<vmem>>, vector<128x128xf32>
    %27 = arith.addf %26, %25 : vector<128x128xf32>
    %c0_24 = arith.constant 0 : index
    %c0_25 = arith.constant 0 : index
    %28 = vector.load %arg7[%c0_24, %c0_25] : memref<128x128xf32, #tpu.memory_space<vmem>>, vector<128x128xf32>
    tpu.vector_store %arg7[%c0_24, %c0_25], %27 {strides = array<i32>} : memref<128x128xf32, #tpu.memory_space<vmem>>, vector<128x128xf32>,
    %c0_i32_26 = arith.constant 0 : i32
    %29 = arith.cmpi eq, %arg2, %c0_i32_26 : i32
    %30 = arith.extui %29 : i1 to i32
    %c0_i32_27 = arith.constant 0 : i32
    %31 = arith.cmpi ne, %30, %c0_i32_27 : i32
    scf.if %31 {
      %c0_28 = arith.constant 0 : index
      %c0_29 = arith.constant 0 : index
      %32 = vector.load %arg7[%c0_28, %c0_29] : memref<128x128xf32, #tpu.memory_space<vmem>>, vector<128x128xf32>
      %c0_30 = arith.constant 0 : index
      %c0_31 = arith.constant 0 : index
      %33 = vector.load %arg5[%c0_30, %c0_31] : memref<1x128xf32, #tpu.memory_space<vmem>>, vector<1x128xf32>
      %34 = vector.broadcast %33 : vector<1x128xf32> to vector<128x128xf32>
      %35 = arith.addf %32, %34 : vector<128x128xf32>
      %c0_32 = arith.constant 0 : index
      %c0_33 = arith.constant 0 : index
      %c0_34 = arith.constant 0 : index
      %36 = vector.load %arg6[%c0_32, %c0_33, %c0_34] : memref<1x128x128xf32, #tpu.memory_space<vmem>>, vector<1x128x128xf32>
      %37 = vector.shape_cast %36 : vector<1x128x128xf32> to vector<128x128xf32>
      %38 = vector.shape_cast %35 : vector<128x128xf32> to vector<1x128x128xf32>
      tpu.vector_store %arg6[%c0_32, %c0_33, %c0_34], %38 {strides = array<i32>} : memref<1x128x128xf32, #tpu.memory_space<vmem>>, vector<1x128x128xf32>,
    } else {
    }
    return
  }
  func.func @transform_0(%arg0: i32, %arg1: i32, %arg2: i32) -> (i32, i32, i32) {
    %c0_i32 = arith.constant 0 : i32
    %c0_i32_0 = arith.constant 0 : i32
    return %arg0, %c0_i32, %arg2 : i32, i32, i32
  }
  func.func @transform_1(%arg0: i32, %arg1: i32, %arg2: i32) -> (i32, i32, i32) {
    %c0_i32 = arith.constant 0 : i32
    %c0_i32_0 = arith.constant 0 : i32
    return %c0_i32, %arg2, %arg1 : i32, i32, i32
  }
  func.func @transform_2(%arg0: i32, %arg1: i32, %arg2: i32) -> (i32, i32) {
    %c0_i32 = arith.constant 0 : i32
    %c0_i32_0 = arith.constant 0 : i32
    return %c0_i32, %arg1 : i32, i32
  }
  func.func @transform_3(%arg0: i32, %arg1: i32, %arg2: i32) -> (i32, i32, i32) {
    %c0_i32 = arith.constant 0 : i32
    %c0_i32_0 = arith.constant 0 : i32
    return %arg0, %c0_i32, %arg1 : i32, i32, i32
  }
}

</mosaic_0001>

<bundles_post_ra>
// kernel: tpu_custom_call.1
= control target key start
LH: loop header
LB: loop body
LE: loop exit
PB: predicated region body
PF: predicated region fallthrough
CT: control target
= control target key end

     0   :  { %8 = vsyncpa [#allocation4], 0  ;;  %s1572_s0 = inlined_call_operand.vmem [shape: f32[2,160,16], index: 0, kind: input, shape index: {}]   ;;  %s1573_s1 = inlined_call_operand.vmem [shape: f32[4,16,128], index: 1, kind: input, shape index: {}]   ;;  %s1574_s2 = inlined_call_operand.vmem [shape: f32[1,128], index: 2, kind: input, shape index: {}]   ;;  %s1575_s3 = inlined_call_operand.hbm [shape: f32[2,128,128], index: 3, kind: output, shape index: {}]  }
   0x1   :  { %10 = vsyncpa [#allocation4 + $0x1], 0  ;;  %s1305_s12 = smov 0   ;;  %s1307_s13 = smov 0  }
   0x2   :  { %s1309_s14 = smov 0   ;;  %s1311_s15 = smov 0  }
   0x3   :  { %s1313_s16 = smov 0   ;;  %s1315_s17 = smov 0  }
   0x4 LB: > { %s1059_s18 = sadd.s32 4294967295, %s1281_s17   ;;  %s1060_s19 = sadd.s32 4294967294, %s1281_s17   ;;  %s1281_s17 = sphi %s1315_s17, %s16_s17   ;;  %s1277_s16 = sphi %s1313_s16, %s1582_s16   ;;  %s1273_s15 = sphi %s1311_s15, %s1581_s15   ;;  %s1269_s14 = sphi %s1309_s14, %s1580_s14   ;;  %s1265_s13 = sphi %s1307_s13, %s1579_s13   ;;  %s1261_s12 = sphi %s1305_s12, %s1578_s12  }
   0x5   : > { %s35_s20 = sadd.s32 1, %s1277_s16  ;;  %s126_s21 = sadd.s32 1, %s1269_s14 }
   0x6   : > { %p37_p0 = scmp.ge.s32.totalorder %s35_s20, 2  ;;  %p136_p1 = scmp.ne.s32.totalorder %s1269_s14, %s1265_s13 }
   0x7   : > { %p137_p2 = scmp.eq.s32.totalorder %s1059_s18, 1  ;;  %p142_p3 = scmp.ne.s32.totalorder %s1265_s13, %s1261_s12 }
   0x8   : > { %s1584_s20 = smov (%p37_p0, %s35_s20), 0  ;;  %p143_p5 = scmp.eq.s32.totalorder %s1060_s19, 1 }
   0x9   : > { %p1345_p4 = por %p137_p2, %p136_p1  ;;  %s121_s23 = ssub.s32 %s1277_s16, %s1584_s20 }
   0xa   : > { %p1065_p6 = scmp.ge.s32.totalorder %s1281_s17, 1  ;;  %p124_p7 = scmp.eq.s32.totalorder %s121_s23, 0 }
   0xb   : > { %p1352_p8 = por %p143_p5, %p142_p3  ;;  %p190_p9 = scmp.lt.s32.totalorder %s1281_s17, 3 }
   0xc   : > { %s1358_s25 = scalar_select %p124_p7, %s1269_s14, %s126_s21  }
   0xd   : > { %p191_p10 = pnand %p1065_p6, %p190_p9 }
   0xe   : > { %p228_p11 = scmp.lt.s32.totalorder (!%p191_p10), %s1273_s15, 1  ;;  %s225_s30 = sand.u32 (!%p191_p10), 1, %s1265_s13  }
   0xf   : > { %194 = sbr.rel (%p191_p10) target bundleno = 288 (0x120), region = 32  ;;  %s1066_s4 = sshll.u32 (!%p191_p10), %s225_s30, 7 }
  0x10   : > { %s1500_s7 = scalar_lea.vmem (!%p191_p10), [#allocation3], %s1066_s4  ;;  %s1143_s8 = sshll.u32 (!%p191_p10), %s1273_s15, 7 }
  0x11   : > { %s945_s18 = sshll.u32 (!%p191_p10), %s1500_s7, 4  ;;  %s1223_s28 = scalar_lea.hbm (!%p191_p10), %s1575_s3, 256  ;;  %s946_s18 = int_to_ptr.vmem [resolvable:$true] %s945_s18 }
  0x14   : > { %v1103_v0 = vld [vmem:[%s1573_s1 + $0x28] sm:$0xff]  ;;  %v1102_v1 = vld [vmem:[%s1573_s1 + $0x20] sm:$0xff]  ;;  %v1121_v2 = vld [vmem:[%s1573_s1 + $0x38] sm:$0xff]  ;;  %s229_s11 = scalar_select %p228_p11, %s1273_s15, 1  ;;  %vm305_vm0 = vcmask 130048  }
  0x15   : > { %613 = vmatpush.msra.mxu2 %v1103_v0  ;;  %761 = vmatpush.msra.mxu3 %v1121_v2  ;;  %v1069_v3 = vld [vmem:[%s1573_s1 + $0x18] sm:$0xff]  ;;  %v285_v4 = vld [vmem:[%s1573_s1 + $0x8] sm:$0xff]  ;;  %v1120_v5 = vld [vmem:[%s1573_s1 + $0x30] sm:$0xff]  ;;  %s932_s15 = scalar_lea.sflag [#allocation4], %s225_s30 }
  0x16   : > { %368 = vmatpush.msra.mxu0 %v1069_v3  ;;  %481 = vmatpush.msra.mxu1 %v285_v4  ;;  %v1068_v6 = vld [vmem:[%s1573_s1 + $0x10] sm:$0xff]  ;;  %v284_v7 = vld [vmem:[%s1573_s1] sm:$0xff]  ;;  %s1144_s26 = smul.u32 160, %s229_s11  ;;  %s944_s11 = scalar_lea.hbm %s1575_s3, %s1143_s8 }
  0x17   : > { %614 = vmatpush.msra.mxu2 %v1102_v1  ;;  %762 = vmatpush.msra.mxu3 %v1120_v5  ;;  %v1497_v50 = vld [vmem:[%s1574_s2] ss:$0 sm:$0xff]  ;;  %s947_s19 = sshll.u32 %s944_s11, 4  ;;  %s948_s19 = int_to_ptr.hbm [resolvable:$true] %s947_s19 }
  0x18   : > { %369 = vmatpush.msra.mxu0 %v1068_v6  ;;  %482 = vmatpush.msra.mxu1 %v284_v7  ;;  %s1389_s29 = scalar_lea.vmem %s1572_s0, %s1144_s26  ;;  %s1217_s21 = sshra.s32 %s948_s19, 4  ;;  %s1218_s21 = int_to_ptr.hbm [resolvable:$true] %s1217_s21 }
  0x19   : > { %v532_v8 = vld [vmem:[%s1389_s29 + $0x10] sm:$0xff]  ;;  %v286_v10 = vld [vmem:[%s1389_s29 + $0x1] sm:$0xff]  ;;  %v533_v12 = vld [vmem:[%s1389_s29 + $0x18] sm:$0xff]  ;;  %s1219_s23 = scalar_lea.hbm %s1218_s21, 128  ;;  %p1224_p1 = scmp.lt.s32.totalorder %s1218_s21, %s1575_s3 }
  0x1a   : > { %v680_v9 = vld [vmem:[%s1389_s29 + $0x11] sm:$0xff]  ;;  %1104 = vmatmul.msk.f32.vlgmr.msra.gmra.mxu2 %vm305_vm0, %v532_v8  ;;  %v268_v11 = vld [vmem:[%s1389_s29] sm:$0xff]  ;;  %1070 = vmatmul.msk.f32.vlgmr.msra.gmra.mxu0 %vm305_vm0, %v286_v10  ;;  %v287_v14 = vld [vmem:[%s1389_s29 + $0x9] sm:$0xff]  ;;  %p1220_p12 = scmp.ne.s32.totalorder %s1218_s21, %s1219_s23  ;;  %p1225_p2 = scmp.lt.s32.totalorder %s1223_s28, %s1219_s23 }
  0x1b   : > { %1122 = vmatmul.msk.f32.vlgmr.msra.gmra.mxu3 %vm305_vm0, %v680_v9  ;;  %1086 = vmatmul.msk.f32.vlgmr.msra.gmra.mxu1 %vm305_vm0, %v268_v11  ;;  %v681_v13 = vld [vmem:[%s1389_s29 + $0x19] sm:$0xff]  ;;  %v269_v15 = vld [vmem:[%s1389_s29 + $0x8] sm:$0xff]  ;;  %v536_v20 = vld [vmem:[%s1389_s29 + $0x30] sm:$0xff] }
  0x1c   : > { %v534_v16 = vld [vmem:[%s1389_s29 + $0x20] sm:$0xff]  ;;  %v535_v18 = vld [vmem:[%s1389_s29 + $0x28] sm:$0xff]  ;;  %v684_v21 = vld [vmem:[%s1389_s29 + $0x31] sm:$0xff]  ;;  %p1221_p13 = pnand %p1220_p12, %p1345_p4  ;;  %p1226_p3 = por %p1225_p2, %p1224_p1 }
  0x1d   : > { %v682_v17 = vld [vmem:[%s1389_s29 + $0x21] sm:$0xff]  ;;  %v683_v19 = vld [vmem:[%s1389_s29 + $0x29] sm:$0xff]  ;;  %v537_v22 = vld [vmem:[%s1389_s29 + $0x38] sm:$0xff] }
  0x1e   : > { %v685_v23 = vld [vmem:[%s1389_s29 + $0x39] sm:$0xff]  ;;  %v686_v25 = vld [vmem:[%s1389_s29 + $0x41] sm:$0xff]  ;;  %v687_v27 = vld [vmem:[%s1389_s29 + $0x49] sm:$0xff]  ;;  %p1222_p0 = pneg %p1221_p13 }
  0x1f   : > { %v538_v24 = vld [vmem:[%s1389_s29 + $0x40] sm:$0xff]  ;;  %v539_v26 = vld [vmem:[%s1389_s29 + $0x48] sm:$0xff]  ;;  %v540_v28 = vld [vmem:[%s1389_s29 + $0x50] sm:$0xff] }
  0x20   : > { %v688_v29 = vld [vmem:[%s1389_s29 + $0x51] sm:$0xff]  ;;  %v689_v31 = vld [vmem:[%s1389_s29 + $0x59] sm:$0xff]  ;;  %v690_v33 = vld [vmem:[%s1389_s29 + $0x61] sm:$0xff]  ;;  %p1227_p5 = pnand %p1226_p3, %p1222_p0 }
  0x21   : > { %v541_v30 = vld [vmem:[%s1389_s29 + $0x58] sm:$0xff]  ;;  %v542_v32 = vld [vmem:[%s1389_s29 + $0x60] sm:$0xff]  ;;  %v543_v34 = vld [vmem:[%s1389_s29 + $0x68] sm:$0xff] }
  0x22   : > { %1105 = vmatmul.msk.f32.gmra.mxu2 %vm305_vm0, %v533_v12  ;;  %1071 = vmatmul.msk.f32.gmra.mxu0 %vm305_vm0, %v287_v14  ;;  %v691_v35 = vld [vmem:[%s1389_s29 + $0x69] sm:$0xff]  ;;  %v692_v37 = vld [vmem:[%s1389_s29 + $0x71] sm:$0xff]  ;;  %v693_v39 = vld [vmem:[%s1389_s29 + $0x79] sm:$0xff] }
  0x23   : > { %1123 = vmatmul.msk.f32.gmra.mxu3 %vm305_vm0, %v681_v13  ;;  %1087 = vmatmul.msk.f32.gmra.mxu1 %vm305_vm0, %v269_v15  ;;  %v544_v36 = vld [vmem:[%s1389_s29 + $0x70] sm:$0xff]  ;;  %v545_v38 = vld [vmem:[%s1389_s29 + $0x78] sm:$0xff]  ;;  %v546_v40 = vld [vmem:[%s1389_s29 + $0x80] sm:$0xff] }
  0x24   : > { %v694_v41 = vld [vmem:[%s1389_s29 + $0x81] sm:$0xff]  ;;  %v695_v43 = vld [vmem:[%s1389_s29 + $0x89] sm:$0xff] }
  0x25   : > { %v547_v42 = vld [vmem:[%s1389_s29 + $0x88] sm:$0xff] }
  0x2a   : > { %1106 = vmatmul.msk.f32.gmra.mxu2 %vm305_vm0, %v534_v16  ;;  %1072 = vmatmul.msk.f32.gmra.mxu0 %vm305_vm0, %v680_v9 }
  0x2b   : > { %1124 = vmatmul.msk.f32.gmra.mxu3 %vm305_vm0, %v682_v17  ;;  %1088 = vmatmul.msk.f32.gmra.mxu1 %vm305_vm0, %v532_v8 }
  0x32   : > { %1107 = vmatmul.msk.f32.gmra.mxu2 %vm305_vm0, %v535_v18  ;;  %1073 = vmatmul.msk.f32.gmra.mxu0 %vm305_vm0, %v681_v13 }
  0x33   : > { %1125 = vmatmul.msk.f32.gmra.mxu3 %vm305_vm0, %v683_v19  ;;  %1089 = vmatmul.msk.f32.gmra.mxu1 %vm305_vm0, %v533_v12 }
  0x3a   : > { %1108 = vmatmul.msk.f32.gmra.mxu2 %vm305_vm0, %v536_v20  ;;  %1074 = vmatmul.msk.f32.gmra.mxu0 %vm305_vm0, %v682_v17 }
  0x3b   : > { %1126 = vmatmul.msk.f32.gmra.mxu3 %vm305_vm0, %v684_v21  ;;  %1090 = vmatmul.msk.f32.gmra.mxu1 %vm305_vm0, %v534_v16 }
  0x42   : > { %1109 = vmatmul.msk.f32.gmra.mxu2 %vm305_vm0, %v537_v22  ;;  %1075 = vmatmul.msk.f32.gmra.mxu0 %vm305_vm0, %v683_v19 }
  0x43   : > { %1127 = vmatmul.msk.f32.gmra.mxu3 %vm305_vm0, %v685_v23  ;;  %1091 = vmatmul.msk.f32.gmra.mxu1 %vm305_vm0, %v535_v18 }
  0x4a   : > { %1110 = vmatmul.msk.f32.gmra.mxu2 %vm305_vm0, %v538_v24  ;;  %1076 = vmatmul.msk.f32.gmra.mxu0 %vm305_vm0, %v684_v21 }
  0x4b   : > { %1128 = vmatmul.msk.f32.gmra.mxu3 %vm305_vm0, %v686_v25  ;;  %1092 = vmatmul.msk.f32.gmra.mxu1 %vm305_vm0, %v536_v20 }
  0x52   : > { %1111 = vmatmul.msk.f32.gmra.mxu2 %vm305_vm0, %v539_v26  ;;  %1077 = vmatmul.msk.f32.gmra.mxu0 %vm305_vm0, %v685_v23 }
  0x53   : > { %1129 = vmatmul.msk.f32.gmra.mxu3 %vm305_vm0, %v687_v27  ;;  %1093 = vmatmul.msk.f32.gmra.mxu1 %vm305_vm0, %v537_v22 }
  0x5a   : > { %1112 = vmatmul.msk.f32.gmra.mxu2 %vm305_vm0, %v540_v28  ;;  %1078 = vmatmul.msk.f32.gmra.mxu0 %vm305_vm0, %v686_v25 }
  0x5b   : > { %1130 = vmatmul.msk.f32.gmra.mxu3 %vm305_vm0, %v688_v29  ;;  %1094 = vmatmul.msk.f32.gmra.mxu1 %vm305_vm0, %v538_v24 }
  0x62   : > { %1113 = vmatmul.msk.f32.gmra.mxu2 %vm305_vm0, %v541_v30  ;;  %1079 = vmatmul.msk.f32.gmra.mxu0 %vm305_vm0, %v687_v27 }
  0x63   : > { %1131 = vmatmul.msk.f32.gmra.mxu3 %vm305_vm0, %v689_v31  ;;  %1095 = vmatmul.msk.f32.gmra.mxu1 %vm305_vm0, %v539_v26 }
  0x6a   : > { %1114 = vmatmul.msk.f32.gmra.mxu2 %vm305_vm0, %v542_v32  ;;  %1080 = vmatmul.msk.f32.gmra.mxu0 %vm305_vm0, %v688_v29 }
  0x6b   : > { %1132 = vmatmul.msk.f32.gmra.mxu3 %vm305_vm0, %v690_v33  ;;  %1096 = vmatmul.msk.f32.gmra.mxu1 %vm305_vm0, %v540_v28 }
  0x72   : > { %1115 = vmatmul.msk.f32.gmra.mxu2 %vm305_vm0, %v543_v34  ;;  %1081 = vmatmul.msk.f32.gmra.mxu0 %vm305_vm0, %v689_v31 }
  0x73   : > { %1133 = vmatmul.msk.f32.gmra.mxu3 %vm305_vm0, %v691_v35  ;;  %1097 = vmatmul.msk.f32.gmra.mxu1 %vm305_vm0, %v541_v30 }
  0x7a   : > { %1116 = vmatmul.msk.f32.gmra.mxu2 %vm305_vm0, %v544_v36  ;;  %1082 = vmatmul.msk.f32.gmra.mxu0 %vm305_vm0, %v690_v33 }
  0x7b   : > { %1134 = vmatmul.msk.f32.gmra.mxu3 %vm305_vm0, %v692_v37  ;;  %1098 = vmatmul.msk.f32.gmra.mxu1 %vm305_vm0, %v542_v32 }
  0x82   : > { %1117 = vmatmul.msk.f32.gmra.mxu2 %vm305_vm0, %v545_v38  ;;  %1083 = vmatmul.msk.f32.gmra.mxu0 %vm305_vm0, %v691_v35 }
  0x83   : > { %1135 = vmatmul.msk.f32.gmra.mxu3 %vm305_vm0, %v693_v39  ;;  %1099 = vmatmul.msk.f32.gmra.mxu1 %vm305_vm0, %v543_v34 }
  0x8a   : > { %1118 = vmatmul.msk.f32.gmra.mxu2 %vm305_vm0, %v546_v40  ;;  %1084 = vmatmul.msk.f32.gmra.mxu0 %vm305_vm0, %v692_v37 }
  0x8b   : > { %1136 = vmatmul.msk.f32.gmra.mxu3 %vm305_vm0, %v694_v41  ;;  %1100 = vmatmul.msk.f32.gmra.mxu1 %vm305_vm0, %v544_v36 }
  0x92   : > { %1119 = vmatmul.msk.f32.gmra.mxu2 %vm305_vm0, %v547_v42  ;;  %1085 = vmatmul.msk.f32.gmra.mxu0 %vm305_vm0, %v693_v39 }
  0x93   : > { %1137 = vmatmul.msk.f32.gmra.mxu3 %vm305_vm0, %v695_v43  ;;  %1101 = vmatmul.msk.f32.gmra.mxu1 %vm305_vm0, %v545_v38 }
  0x97   : > { %v371_v44 = vpop.f32.mrf.mxu0 }
  0x98   : > { %v484_v45 = vpop.f32.mrf.mxu1 }
  0x99   : > { %v485_v46 = vadd.f32 %v484_v45, %v371_v44 }
  0x9d   : > { %v616_v47 = vpop.f32.mrf.mxu2 }
  0x9e   : > { %v764_v48 = vpop.f32.mrf.mxu3  ;;  %v664_v49 = vadd.f32 %v616_v47, %v485_v46 }
  0x9f   : > { %v374_v52 = vpop.f32.mrf.mxu0 }
  0xa0   : > { %v812_v51 = vadd.f32 %v764_v48, %v664_v49  ;;  %v487_v53 = vpop.f32.mrf.mxu1 }
  0xa1   : > { %v488_v55 = vadd.f32 %v487_v53, %v374_v52 }
  0xa2   : > { %v899_v54 = vadd.f32 %v1497_v50, %v812_v51 }
  0xa4   : > { %915 = vst [vmem:[%s1500_s7] sm:$0xff] %v899_v54 }
  0xa5   : > { %v619_v56 = vpop.f32.mrf.mxu2 }
  0xa6   : > { %v767_v57 = vpop.f32.mrf.mxu3  ;;  %v665_v58 = vadd.f32 %v619_v56, %v488_v55 }
  0xa7   : > { %v377_v60 = vpop.f32.mrf.mxu0 }
  0xa8   : > { %v813_v59 = vadd.f32 %v767_v57, %v665_v58  ;;  %v490_v61 = vpop.f32.mrf.mxu1 }
  0xa9   : > { %v491_v63 = vadd.f32 %v490_v61, %v377_v60 }
  0xaa   : > { %v900_v62 = vadd.f32 %v1497_v50, %v813_v59 }
  0xac   : > { %916 = vst [vmem:[%s1500_s7 + $0x8] sm:$0xff] %v900_v62 }
  0xad   : > { %v622_v0 = vpop.f32.mrf.mxu2 }
  0xae   : > { %v770_v1 = vpop.f32.mrf.mxu3  ;;  %v666_v2 = vadd.f32 %v622_v0, %v491_v63 }
  0xaf   : > { %v380_v4 = vpop.f32.mrf.mxu0 }
  0xb0   : > { %v814_v3 = vadd.f32 %v770_v1, %v666_v2  ;;  %v493_v5 = vpop.f32.mrf.mxu1 }
  0xb1   : > { %v494_v7 = vadd.f32 %v493_v5, %v380_v4 }
  0xb2   : > { %v901_v6 = vadd.f32 %v1497_v50, %v814_v3 }
  0xb4   : > { %917 = vst [vmem:[%s1500_s7 + $0x10] sm:$0xff] %v901_v6 }
  0xb5   : > { %v625_v8 = vpop.f32.mrf.mxu2 }
  0xb6   : > { %v773_v9 = vpop.f32.mrf.mxu3  ;;  %v667_v10 = vadd.f32 %v625_v8, %v494_v7 }
  0xb7   : > { %v383_v12 = vpop.f32.mrf.mxu0 }
  0xb8   : > { %v815_v11 = vadd.f32 %v773_v9, %v667_v10  ;;  %v496_v13 = vpop.f32.mrf.mxu1 }
  0xb9   : > { %v497_v15 = vadd.f32 %v496_v13, %v383_v12 }
  0xba   : > { %v902_v14 = vadd.f32 %v1497_v50, %v815_v11 }
  0xbc   : > { %918 = vst [vmem:[%s1500_s7 + $0x18] sm:$0xff] %v902_v14 }
  0xbd   : > { %v628_v16 = vpop.f32.mrf.mxu2 }
  0xbe   : > { %v776_v17 = vpop.f32.mrf.mxu3  ;;  %v668_v18 = vadd.f32 %v628_v16, %v497_v15 }
  0xbf   : > { %v386_v20 = vpop.f32.mrf.mxu0 }
  0xc0   : > { %v816_v19 = vadd.f32 %v776_v17, %v668_v18  ;;  %v499_v21 = vpop.f32.mrf.mxu1 }
  0xc1   : > { %v500_v23 = vadd.f32 %v499_v21, %v386_v20 }
  0xc2   : > { %v903_v22 = vadd.f32 %v1497_v50, %v816_v19 }
  0xc4   : > { %919 = vst [vmem:[%s1500_s7 + $0x20] sm:$0xff] %v903_v22 }
  0xc5   : > { %v631_v24 = vpop.f32.mrf.mxu2 }
  0xc6   : > { %v779_v25 = vpop.f32.mrf.mxu3  ;;  %v669_v26 = vadd.f32 %v631_v24, %v500_v23 }
  0xc7   : > { %v389_v28 = vpop.f32.mrf.mxu0 }
  0xc8   : > { %v817_v27 = vadd.f32 %v779_v25, %v669_v26  ;;  %v502_v29 = vpop.f32.mrf.mxu1 }
  0xc9   : > { %v503_v31 = vadd.f32 %v502_v29, %v389_v28 }
  0xca   : > { %v904_v30 = vadd.f32 %v1497_v50, %v817_v27 }
  0xcc   : > { %920 = vst [vmem:[%s1500_s7 + $0x28] sm:$0xff] %v904_v30 }
  0xcd   : > { %v634_v32 = vpop.f32.mrf.mxu2 }
  0xce   : > { %v782_v33 = vpop.f32.mrf.mxu3  ;;  %v670_v34 = vadd.f32 %v634_v32, %v503_v31 }
  0xcf   : > { %v392_v36 = vpop.f32.mrf.mxu0 }
  0xd0   : > { %v818_v35 = vadd.f32 %v782_v33, %v670_v34  ;;  %v505_v37 = vpop.f32.mrf.mxu1 }
  0xd1   : > { %v506_v39 = vadd.f32 %v505_v37, %v392_v36 }
  0xd2   : > { %v905_v38 = vadd.f32 %v1497_v50, %v818_v35 }
  0xd4   : > { %921 = vst [vmem:[%s1500_s7 + $0x30] sm:$0xff] %v905_v38 }
  0xd5   : > { %v637_v40 = vpop.f32.mrf.mxu2 }
  0xd6   : > { %v785_v41 = vpop.f32.mrf.mxu3  ;;  %v671_v42 = vadd.f32 %v637_v40, %v506_v39 }
  0xd7   : > { %v395_v44 = vpop.f32.mrf.mxu0 }
  0xd8   : > { %v819_v43 = vadd.f32 %v785_v41, %v671_v42  ;;  %v508_v45 = vpop.f32.mrf.mxu1 }
  0xd9   : > { %v509_v47 = vadd.f32 %v508_v45, %v395_v44 }
  0xda   : > { %v906_v46 = vadd.f32 %v1497_v50, %v819_v43 }
  0xdc   : > { %922 = vst [vmem:[%s1500_s7 + $0x38] sm:$0xff] %v906_v46 }
  0xdd   : > { %v640_v48 = vpop.f32.mrf.mxu2 }
  0xde   : > { %v788_v49 = vpop.f32.mrf.mxu3  ;;  %v672_v51 = vadd.f32 %v640_v48, %v509_v47 }
  0xdf   : > { %v398_v53 = vpop.f32.mrf.mxu0 }
  0xe0   : > { %v820_v52 = vadd.f32 %v788_v49, %v672_v51  ;;  %v511_v54 = vpop.f32.mrf.mxu1 }
  0xe1   : > { %v512_v56 = vadd.f32 %v511_v54, %v398_v53 }
  0xe2   : > { %v907_v55 = vadd.f32 %v1497_v50, %v820_v52 }
  0xe4   : > { %923 = vst [vmem:[%s1500_s7 + $0x40] sm:$0xff] %v907_v55 }
  0xe5   : > { %v643_v57 = vpop.f32.mrf.mxu2 }
  0xe6   : > { %v791_v58 = vpop.f32.mrf.mxu3  ;;  %v673_v59 = vadd.f32 %v643_v57, %v512_v56 }
  0xe7   : > { %v401_v61 = vpop.f32.mrf.mxu0 }
  0xe8   : > { %v821_v60 = vadd.f32 %v791_v58, %v673_v59  ;;  %v514_v62 = vpop.f32.mrf.mxu1 }
  0xe9   : > { %v515_v0 = vadd.f32 %v514_v62, %v401_v61 }
  0xea   : > { %v908_v63 = vadd.f32 %v1497_v50, %v821_v60 }
  0xec   : > { %924 = vst [vmem:[%s1500_s7 + $0x48] sm:$0xff] %v908_v63 }
  0xed   : > { %v646_v1 = vpop.f32.mrf.mxu2 }
  0xee   : > { %v794_v2 = vpop.f32.mrf.mxu3  ;;  %v674_v3 = vadd.f32 %v646_v1, %v515_v0 }
  0xef   : > { %v404_v5 = vpop.f32.mrf.mxu0 }
  0xf0   : > { %v822_v4 = vadd.f32 %v794_v2, %v674_v3  ;;  %v517_v6 = vpop.f32.mrf.mxu1 }
  0xf1   : > { %v518_v8 = vadd.f32 %v517_v6, %v404_v5 }
  0xf2   : > { %v909_v7 = vadd.f32 %v1497_v50, %v822_v4 }
  0xf4   : > { %925 = vst [vmem:[%s1500_s7 + $0x50] sm:$0xff] %v909_v7 }
  0xf5   : > { %v649_v9 = vpop.f32.mrf.mxu2 }
  0xf6   : > { %v797_v10 = vpop.f32.mrf.mxu3  ;;  %v675_v11 = vadd.f32 %v649_v9, %v518_v8 }
  0xf7   : > { %v407_v13 = vpop.f32.mrf.mxu0 }
  0xf8   : > { %v823_v12 = vadd.f32 %v797_v10, %v675_v11  ;;  %v520_v14 = vpop.f32.mrf.mxu1 }
  0xf9   : > { %v521_v16 = vadd.f32 %v520_v14, %v407_v13 }
  0xfa   : > { %v910_v15 = vadd.f32 %v1497_v50, %v823_v12 }
  0xfc   : > { %926 = vst [vmem:[%s1500_s7 + $0x58] sm:$0xff] %v910_v15 }
  0xfd   : > { %v652_v17 = vpop.f32.mrf.mxu2 }
  0xfe   : > { %v800_v18 = vpop.f32.mrf.mxu3  ;;  %v676_v19 = vadd.f32 %v652_v17, %v521_v16 }
  0xff   : > { %v410_v21 = vpop.f32.mrf.mxu0 }
 0x100   : > { %v824_v20 = vadd.f32 %v800_v18, %v676_v19  ;;  %v523_v22 = vpop.f32.mrf.mxu1 }
 0x101   : > { %v524_v24 = vadd.f32 %v523_v22, %v410_v21 }
 0x102   : > { %v911_v23 = vadd.f32 %v1497_v50, %v824_v20 }
 0x104   : > { %927 = vst [vmem:[%s1500_s7 + $0x60] sm:$0xff] %v911_v23 }
 0x105   : > { %v655_v25 = vpop.f32.mrf.mxu2 }
 0x106   : > { %v803_v26 = vpop.f32.mrf.mxu3  ;;  %v677_v27 = vadd.f32 %v655_v25, %v524_v24 }
 0x107   : > { %v413_v29 = vpop.f32.mrf.mxu0 }
 0x108   : > { %v825_v28 = vadd.f32 %v803_v26, %v677_v27  ;;  %v526_v30 = vpop.f32.mrf.mxu1 }
 0x109   : > { %v527_v32 = vadd.f32 %v526_v30, %v413_v29 }
 0x10a   : > { %v912_v31 = vadd.f32 %v1497_v50, %v825_v28 }
 0x10c   : > { %928 = vst [vmem:[%s1500_s7 + $0x68] sm:$0xff] %v912_v31 }
 0x10d   : > { %v658_v33 = vpop.f32.mrf.mxu2 }
 0x10e   : > { %v806_v34 = vpop.f32.mrf.mxu3  ;;  %v678_v35 = vadd.f32 %v658_v33, %v527_v32 }
 0x10f   : > { %v416_v37 = vpop.f32.mrf.mxu0 }
 0x110   : > { %v826_v36 = vadd.f32 %v806_v34, %v678_v35  ;;  %v529_v38 = vpop.f32.mrf.mxu1 }
 0x111   : > { %v530_v40 = vadd.f32 %v529_v38, %v416_v37 }
 0x112   : > { %v913_v39 = vadd.f32 %v1497_v50, %v826_v36 }
 0x114   : > { %929 = vst [vmem:[%s1500_s7 + $0x70] sm:$0xff] %v913_v39 }
 0x115   : > { %v661_v41 = vpop.f32.mrf.mxu2 }
 0x116   : > { %v809_v42 = vpop.f32.mrf.mxu3  ;;  %v679_v43 = vadd.f32 %v661_v41, %v530_v40 }
 0x118   : > { %v827_v44 = vadd.f32 %v809_v42, %v679_v43 }
 0x11a   : > { %v914_v45 = vadd.f32 %v1497_v50, %v827_v44 }
 0x11c   : > { %930 = vst [vmem:[%s1500_s7 + $0x78] sm:$0xff] %v914_v45 }
 0x11d   : > { %1230 = shalt.err (!%p1227_p5)
}
 0x11e   : > { %s1283_s30 = smov 128   ;;  %s1284_s5 = smov 8  }
 0x11f   : > { %1145 = dma.vmem_to_hbm [thread:$0]  (%p1345_p4), %s946_s18, 2048, %s948_s19, %s932_s15, %s1283_s30, %s1283_s30, %s1284_s5  }
 0x120 PF: > { %p1151_p6 = scmp.ge.s32.totalorder %s1281_s17, 2  ;;  %s962_s6 = sand.u32 1, %s1261_s12  }
 0x121   : > { %s963_s7 = scalar_lea.sflag [#allocation4], %s962_s6 }
 0x122   : > { %p1148_p7 = pnand %p1151_p6, %p1352_p8 }
 0x124   : > { %p1149_p9 = pneg %p1148_p7 }
 0x126   : > { %1256 = dma.done.wait (%p1149_p9), %s963_s7, 2048  }
 0x127   : > { %1258 = vsyncadd (%p1149_p9), %s963_s7, 4294965248  ;;  %s16_s17 = sadd.s32 1, %s1281_s17   ;;  %s1578_s12 = smov %s1265_s13 }
 0x128   : > { %p13_p10 = scmp.ge.s32.totalorder %s16_s17, 4   ;;  %s1579_s13 = smov %s1269_s14 }
 0x129   : > { %s1580_s14 = smov %s1358_s25  ;;  %s1581_s15 = smov %s1277_s16 }
 0x12a   : > { %s1582_s16 = smov %s1584_s20  ;;  %15 = sbr.rel (!%p13_p10) target bundleno = 4 (0x4), region = 84 }
 0x12f   :  { %969 = vsyncpa [#allocation4], 1 }
 0x130   :  { %971 = vsyncpa [#allocation4 + $0x1], 1 }

</bundles_post_ra>
